<compile_context>
chip_gen: v6e
topology: v6e:2x2x1
jax: 0.10.0
libtpu: 0.0.40
codegen_flags: <defaults>
</compile_context>

<pallas_src>
import jax
import jax.numpy as jnp
from jax.experimental import pallas as pl
from jax.experimental.pallas import tpu as pltpu


def _rup(x, m):
    return ((x + m - 1) // m) * m


# ----------------------------------------------------------------------------
# Fused Linear + bias + Sigmoid kernel.
# One MXU matmul (bf16 in, f32 accumulate) followed by a bias add and a
# sigmoid built from exp + approximate reciprocal (both EUP ops).
# ----------------------------------------------------------------------------
def _linear_sigmoid_kernel(x_ref, w_ref, b_ref, o_ref):
    z = jnp.dot(x_ref[...], w_ref[...], preferred_element_type=jnp.float32)
    z = z + b_ref[...]                       # bias row broadcast, f32
    o_ref[...] = pl.reciprocal(1.0 + jnp.exp(-z), approx=True)


@jax.jit
def linear_sigmoid(x, w_t, b):
    """x: [M, K], w_t: [K, N] bf16 (pre-transposed torch weight), b: [N] f32."""
    M, K = x.shape
    K2, N = w_t.shape
    assert K == K2 and b.shape == (N,)
    assert N % 128 == 0 and K % 128 == 0     # 512/512: lane-dense, no padding

    # Only the (small) batch dim needs sublane padding; row-block <= 256 so the
    # resident working set stays tiny and large batches still shard across TCs.
    Mp = _rup(max(M, 8), 8)
    bm = Mp if Mp <= 256 else 256
    Mp = _rup(Mp, bm)

    xp = x if Mp == M else jnp.pad(x, ((0, Mp - M), (0, 0)))
    xp = xp.astype(jnp.bfloat16)             # bf16 LHS for the MXU
    b2 = b.reshape(1, N)                     # f32 bias row

    out = pl.pallas_call(
        _linear_sigmoid_kernel,
        out_shape=jax.ShapeDtypeStruct((Mp, N), jnp.float32),
        grid=(Mp // bm,),
        in_specs=[
            pl.BlockSpec((bm, K), lambda i: (i, 0)),   # activations (bf16)
            pl.BlockSpec((K, N), lambda i: (0, 0)),    # weight, grid-invariant
            pl.BlockSpec((1, N), lambda i: (0, 0)),    # bias row
        ],
        out_specs=pl.BlockSpec((bm, N), lambda i: (i, 0)),
        compiler_params=pltpu.CompilerParams(
            dimension_semantics=("parallel",)),
    )(xp, w_t, b2)
    return out[:M]


# ----------------------------------------------------------------------------
# parameters (deterministic synthetic weights; torch Linear [out, in] layout is
# transposed ONCE at build time into matmul layout [in, out] and stored bf16)
# ----------------------------------------------------------------------------
def build_params(gd_channel=512, out_channel=512):
    key = jax.random.PRNGKey(0)
    kw, kb = jax.random.split(key)
    w = 0.05 * jax.random.normal(kw, (out_channel, gd_channel), dtype=jnp.float32)
    b = 0.05 * jax.random.normal(kb, (out_channel,), dtype=jnp.float32)
    return {"w_t": jnp.transpose(w).astype(jnp.bfloat16),   # [in, out], bf16
            "b": b}                                          # f32 bias


def height_extractor_forward(params, x):
    """x: [B, 512] -> sigmoid(x @ W.T + b): [B, 512]."""
    return linear_sigmoid(x, params["w_t"], params["b"])


# ----------------------------------------------------------------------------
# main
# ----------------------------------------------------------------------------
if __name__ == "__main__":
    GD_CHANNEL = 512
    OUT_CHANNEL = 512
    params = build_params(GD_CHANNEL, OUT_CHANNEL)

    key = jax.random.PRNGKey(0)
    B = 2
    x = jax.random.normal(jax.random.fold_in(key, 1), (B, GD_CHANNEL),
                          dtype=jnp.float32)

    out = height_extractor_forward(params, x)
    out = jax.block_until_ready(out)

    # sanity check against plain-JAX Linear + Sigmoid (bf16 weights/inputs ->
    # relaxed tolerance)
    ref = jax.nn.sigmoid(x @ params["w_t"].astype(jnp.float32)
                         + params["b"][None, :])
    assert out.shape == (B, OUT_CHANNEL)
    assert float(jnp.max(jnp.abs(out - ref))) < 2e-2

    print("KERNEL_OK")
</pallas_src>

<mosaic_0001>
module attributes {stable_mosaic.version = 11 : i64} {
  func.func @_linear_sigmoid_kernel(%arg0: i32, %arg1: memref<8x512xbf16, #tpu.memory_space<vmem>>, %arg2: memref<512x512xbf16, #tpu.memory_space<vmem>>, %arg3: memref<1x512xf32, #tpu.memory_space<vmem>>, %arg4: memref<8x512xf32, #tpu.memory_space<vmem>>) attributes {dimension_semantics = [#tpu.dimension_semantics<parallel>], iteration_bounds = array<i64: 1>, scalar_prefetch = 0 : i64, scratch_operands = 0 : i64, tpu.core_type = #tpu.core_type<tc>, window_params = [{transform_indices = @transform_0, window_bounds = array<i64: 8, 512>}, {pipeline_mode = #tpu.pipeline_mode<synchronous>, transform_indices = @transform_1, window_bounds = array<i64: 512, 512>}, {pipeline_mode = #tpu.pipeline_mode<synchronous>, transform_indices = @transform_2, window_bounds = array<i64: 1, 512>}, {transform_indices = @transform_3, window_bounds = array<i64: 8, 512>}]} {
    %c0 = arith.constant 0 : index
    %c0_0 = arith.constant 0 : index
    %0 = vector.load %arg1[%c0, %c0_0] : memref<8x512xbf16, #tpu.memory_space<vmem>>, vector<8x512xbf16>
    %c0_1 = arith.constant 0 : index
    %c0_2 = arith.constant 0 : index
    %1 = vector.load %arg2[%c0_1, %c0_2] : memref<512x512xbf16, #tpu.memory_space<vmem>>, vector<512x512xbf16>
    %cst = arith.constant dense<0.000000e+00> : vector<8x512xf32>
    %2 = tpu.matmul %0, %1, %cst {dimension_numbers = #tpu.dot_dimension_numbers<[1], [0], [0], [1], [0, 0, 1, 1], [], []>} : vector<8x512xbf16>, vector<512x512xbf16>, vector<8x512xf32> -> vector<8x512xf32>
    %c0_3 = arith.constant 0 : index
    %c0_4 = arith.constant 0 : index
    %3 = vector.load %arg3[%c0_3, %c0_4] : memref<1x512xf32, #tpu.memory_space<vmem>>, vector<1x512xf32>
    %4 = vector.broadcast %3 : vector<1x512xf32> to vector<8x512xf32>
    %5 = arith.addf %2, %4 : vector<8x512xf32>
    %cst_5 = arith.constant 0.000000e+00 : f32
    %6 = vector.broadcast %cst_5 : f32 to vector<8x512xf32>
    %7 = arith.subf %6, %5 : vector<8x512xf32>
    %8 = math.exp %7 : vector<8x512xf32>
    %cst_6 = arith.constant 1.000000e+00 : f32
    %9 = vector.broadcast %cst_6 : f32 to vector<8x512xf32>
    %10 = arith.addf %9, %8 : vector<8x512xf32>
    %11 = tpu.reciprocal %10 {approx = true} : vector<8x512xf32> -> vector<8x512xf32>
    %c0_7 = arith.constant 0 : index
    %c0_8 = arith.constant 0 : index
    %12 = vector.load %arg4[%c0_7, %c0_8] : memref<8x512xf32, #tpu.memory_space<vmem>>, vector<8x512xf32>
    tpu.vector_store %arg4[%c0_7, %c0_8], %11 {strides = array<i32>} : memref<8x512xf32, #tpu.memory_space<vmem>>, vector<8x512xf32>,
    return
  }
  func.func @transform_0(%arg0: i32) -> (i32, i32) {
    %c0_i32 = arith.constant 0 : i32
    %c0_i32_0 = arith.constant 0 : i32
    return %arg0, %c0_i32 : i32, i32
  }
  func.func @transform_1(%arg0: i32) -> (i32, i32) {
    %c0_i32 = arith.constant 0 : i32
    %c0_i32_0 = arith.constant 0 : i32
    %c0_i32_1 = arith.constant 0 : i32
    return %c0_i32, %c0_i32_0 : i32, i32
  }
  func.func @transform_2(%arg0: i32) -> (i32, i32) {
    %c0_i32 = arith.constant 0 : i32
    %c0_i32_0 = arith.constant 0 : i32
    %c0_i32_1 = arith.constant 0 : i32
    return %c0_i32, %c0_i32_0 : i32, i32
  }
  func.func @transform_3(%arg0: i32) -> (i32, i32) {
    %c0_i32 = arith.constant 0 : i32
    %c0_i32_0 = arith.constant 0 : i32
    return %arg0, %c0_i32 : i32, i32
  }
}

</mosaic_0001>

<bundles_post_ra>
// kernel: linear_sigmoid.1
= control target key start
LH: loop header
LB: loop body
LE: loop exit
PB: predicated region body
PF: predicated region fallthrough
CT: control target
= control target key end

     0   :  { %8 = vsyncpa [#allocation3], 0  ;;  %s1396_s12 = smov [#allocation2]   ;;  %s1455_s0 = inlined_call_operand.vmem [shape: bf16[8,512], index: 0, kind: input, shape index: {}]   ;;  %s1456_s1 = inlined_call_operand.hbm [shape: bf16[512,512], index: 1, kind: input, shape index: {}]   ;;  %s1457_s2 = inlined_call_operand.vmem [shape: f32[1,512], index: 2, kind: input, shape index: {}]   ;;  %s1458_s3 = inlined_call_operand.vmem [shape: f32[8,512], index: 3, kind: output, shape index: {}]  }
   0x1   :  { %s16_s13 = sshll.u32 %s1396_s12, 4  ;;  %s17_s13 = int_to_ptr.vmem [resolvable:$true] %s16_s13 }
   0x2   :  { %s1382_s14 = scalar_lea.vmem %s17_s13, 16384  ;;  %p1387_p1 = scmp.lt.s32.totalorder %s17_s13, %s17_s13 }
   0x3   :  { %p1383_p0 = scmp.ne.s32.totalorder %s17_s13, %s1382_s14  ;;  %p1388_p2 = scmp.lt.s32.totalorder %s1382_s14, %s1382_s14 }
   0x5   :  { %p1389_p3 = por %p1388_p2, %p1387_p1 }
   0x7   :  { %p1390_p4 = pnand %p1389_p3, %p1383_p0 }
   0x9   :  { %1393 = shalt.err (!%p1390_p4)
}
   0xa   :  { %s1397_s15 = smov 256   ;;  %s1398_s16 = smov 16  }
   0xb   :  { %22 = dma.hbm_to_vmem [thread:$0]  %s1456_s1, 16384, %s17_s13, [#allocation3], %s1397_s15, %s1397_s15, %s1398_s16  }
   0xc   :  { %1394 = dma.done.wait [#allocation3], 16384  }
   0xd   :  { %1395 = vsyncadd [#allocation3], 4294950912  ;;  %v1162_v0 = vld [vmem:[#allocation2 + $0xe4] ss:$16 sps:$4 sm:$0xff]   ;;  %v1166_v2 = vld [vmem:[#allocation2 + $0xe0] ss:$16 sps:$4 sm:$0xff]  }
   0xe   :  { %v1164_v1 = vld [vmem:[#allocation2 + $0x2e4] ss:$16 sps:$4 sm:$0xff]   ;;  %834 = vmatprep.subr.bf16.mxu0 %v1162_v0  ;;  %v1167_v3 = vld [vmem:[#allocation2 + $0x2e0] ss:$16 sps:$4 sm:$0xff]   ;;  %v29_v48 = vld [vmem:[%s1455_s0 + $0x8] sm:$0xff] }
   0xf   :  { %875 = vmatprep.subr.bf16.mxu1 %v1164_v1  ;;  %v1168_v4 = vld [vmem:[#allocation2 + $0xc4] ss:$16 sps:$4 sm:$0xff]   ;;  %835 = vmatpush1.bf16.msra.mxu0 %v1166_v2  ;;  %v1172_v6 = vld [vmem:[#allocation2 + $0xc0] ss:$16 sps:$4 sm:$0xff]   ;;  %v1030_v51 = vcombine.high %v29_v48, %v29_v48 }
  0x10   :  { %876 = vmatpush1.bf16.msra.mxu1 %v1167_v3  ;;  %v1170_v5 = vld [vmem:[#allocation2 + $0x2c4] ss:$16 sps:$4 sm:$0xff]   ;;  %836 = vmatprep.subr.bf16.mxu0 %v1168_v4  ;;  %v1173_v7 = vld [vmem:[#allocation2 + $0x2c0] ss:$16 sps:$4 sm:$0xff]   ;;  %v1264_v4 = vld [vmem:[#allocation2 + $0xec] ss:$16 sps:$4 sm:$0xff]  }
  0x11   :  { %877 = vmatprep.subr.bf16.mxu1 %v1170_v5  ;;  %v1174_v8 = vld [vmem:[#allocation2 + $0xa4] ss:$16 sps:$4 sm:$0xff]   ;;  %v1178_v10 = vld [vmem:[#allocation2 + $0xa0] ss:$16 sps:$4 sm:$0xff]   ;;  %907 = vmatprep.mubr.bf16.mxu1 %v1030_v51  ;;  %v1267_v5 = vld [vmem:[#allocation2 + $0x2ec] ss:$16 sps:$4 sm:$0xff]  }
  0x12   :  { %v1176_v9 = vld [vmem:[#allocation2 + $0x2a4] ss:$16 sps:$4 sm:$0xff]   ;;  %v1179_v11 = vld [vmem:[#allocation2 + $0x2a0] ss:$16 sps:$4 sm:$0xff]  }
  0x13   :  { %837 = vmatpush1.bf16.msra.mxu0 %v1172_v6  ;;  %v1180_v12 = vld [vmem:[#allocation2 + $0x84] ss:$16 sps:$4 sm:$0xff]   ;;  %v1184_v14 = vld [vmem:[#allocation2 + $0x80] ss:$16 sps:$4 sm:$0xff]  }
  0x14   :  { %878 = vmatpush1.bf16.msra.mxu1 %v1173_v7  ;;  %838 = vmatprep.subr.bf16.mxu0 %v1174_v8  ;;  %v1182_v13 = vld [vmem:[#allocation2 + $0x284] ss:$16 sps:$4 sm:$0xff]   ;;  %v1185_v15 = vld [vmem:[#allocation2 + $0x280] ss:$16 sps:$4 sm:$0xff]   ;;  %v1433_v7 = vcombine.low %v29_v48, %v29_v48  ;;  %v1262_v8 = vld [vmem:[#allocation2 + $0xe8] ss:$16 sps:$4 sm:$0xff]  }
  0x15   :  { %879 = vmatprep.subr.bf16.mxu1 %v1176_v9  ;;  %v1186_v16 = vld [vmem:[#allocation2 + $0x64] ss:$16 sps:$4 sm:$0xff]   ;;  %v1190_v18 = vld [vmem:[#allocation2 + $0x60] ss:$16 sps:$4 sm:$0xff]   ;;  %v1265_v9 = vld [vmem:[#allocation2 + $0x2e8] ss:$16 sps:$4 sm:$0xff]  }
  0x16   :  { %v1188_v17 = vld [vmem:[#allocation2 + $0x264] ss:$16 sps:$4 sm:$0xff]   ;;  %v1191_v19 = vld [vmem:[#allocation2 + $0x260] ss:$16 sps:$4 sm:$0xff]   ;;  %v1322_v48 = vld [vmem:[#allocation2 + $0x1a8] ss:$16 sps:$4 sm:$0xff]  }
  0x17   :  { %839 = vmatpush1.bf16.msra.mxu0 %v1178_v10  ;;  %v1192_v20 = vld [vmem:[#allocation2 + $0x44] ss:$16 sps:$4 sm:$0xff]   ;;  %v1196_v22 = vld [vmem:[#allocation2 + $0x40] ss:$16 sps:$4 sm:$0xff]   ;;  %v1270_v10 = vld [vmem:[#allocation2 + $0xcc] ss:$16 sps:$4 sm:$0xff]  }
  0x18   :  { %880 = vmatpush1.bf16.msra.mxu1 %v1179_v11  ;;  %840 = vmatprep.subr.bf16.mxu0 %v1180_v12  ;;  %v1194_v21 = vld [vmem:[#allocation2 + $0x244] ss:$16 sps:$4 sm:$0xff]   ;;  %v1197_v23 = vld [vmem:[#allocation2 + $0x240] ss:$16 sps:$4 sm:$0xff]   ;;  %v1273_v11 = vld [vmem:[#allocation2 + $0x2cc] ss:$16 sps:$4 sm:$0xff]  }
  0x19   :  { %881 = vmatprep.subr.bf16.mxu1 %v1182_v13  ;;  %v1198_v24 = vld [vmem:[#allocation2 + $0x24] ss:$16 sps:$4 sm:$0xff]   ;;  %v1202_v26 = vld [vmem:[#allocation2 + $0x20] ss:$16 sps:$4 sm:$0xff]   ;;  %v1268_v12 = vld [vmem:[#allocation2 + $0xc8] ss:$16 sps:$4 sm:$0xff]  }
  0x1a   :  { %v1200_v25 = vld [vmem:[#allocation2 + $0x224] ss:$16 sps:$4 sm:$0xff]   ;;  %v1203_v27 = vld [vmem:[#allocation2 + $0x220] ss:$16 sps:$4 sm:$0xff]   ;;  %v1271_v13 = vld [vmem:[#allocation2 + $0x2c8] ss:$16 sps:$4 sm:$0xff]  }
  0x1b   :  { %841 = vmatpush1.bf16.msra.mxu0 %v1184_v14  ;;  %v1204_v28 = vld [vmem:[#allocation2 + $0x4] ss:$16 sps:$4 sm:$0xff]   ;;  %v1208_v30 = vld [vmem:[#allocation2] ss:$16 sps:$4 sm:$0xff]   ;;  %v1276_v14 = vld [vmem:[#allocation2 + $0xac] ss:$16 sps:$4 sm:$0xff]  }
  0x1c   :  { %882 = vmatpush1.bf16.msra.mxu1 %v1185_v15  ;;  %842 = vmatprep.subr.bf16.mxu0 %v1186_v16  ;;  %v1206_v29 = vld [vmem:[#allocation2 + $0x204] ss:$16 sps:$4 sm:$0xff]   ;;  %v1209_v31 = vld [vmem:[#allocation2 + $0x200] ss:$16 sps:$4 sm:$0xff]   ;;  %v1279_v15 = vld [vmem:[#allocation2 + $0x2ac] ss:$16 sps:$4 sm:$0xff]  }
  0x1d   :  { %883 = vmatprep.subr.bf16.mxu1 %v1188_v17  ;;  %v1210_v32 = vld [vmem:[#allocation2 + $0x1e4] ss:$16 sps:$4 sm:$0xff]   ;;  %v1214_v34 = vld [vmem:[#allocation2 + $0x1e0] ss:$16 sps:$4 sm:$0xff]   ;;  %v1274_v16 = vld [vmem:[#allocation2 + $0xa8] ss:$16 sps:$4 sm:$0xff]  }
  0x1e   :  { %v1212_v33 = vld [vmem:[#allocation2 + $0x3e4] ss:$16 sps:$4 sm:$0xff]   ;;  %v1215_v35 = vld [vmem:[#allocation2 + $0x3e0] ss:$16 sps:$4 sm:$0xff]   ;;  %v1277_v17 = vld [vmem:[#allocation2 + $0x2a8] ss:$16 sps:$4 sm:$0xff]  }
  0x1f   :  { %843 = vmatpush1.bf16.msra.mxu0 %v1190_v18  ;;  %v1216_v36 = vld [vmem:[#allocation2 + $0x1c4] ss:$16 sps:$4 sm:$0xff]   ;;  %v1220_v38 = vld [vmem:[#allocation2 + $0x1c0] ss:$16 sps:$4 sm:$0xff]   ;;  %v1282_v18 = vld [vmem:[#allocation2 + $0x8c] ss:$16 sps:$4 sm:$0xff]  }
  0x20   :  { %884 = vmatpush1.bf16.msra.mxu1 %v1191_v19  ;;  %844 = vmatprep.subr.bf16.mxu0 %v1192_v20  ;;  %v1218_v37 = vld [vmem:[#allocation2 + $0x3c4] ss:$16 sps:$4 sm:$0xff]   ;;  %v1221_v39 = vld [vmem:[#allocation2 + $0x3c0] ss:$16 sps:$4 sm:$0xff]   ;;  %v1285_v19 = vld [vmem:[#allocation2 + $0x28c] ss:$16 sps:$4 sm:$0xff]  }
  0x21   :  { %885 = vmatprep.subr.bf16.mxu1 %v1194_v21  ;;  %v1222_v40 = vld [vmem:[#allocation2 + $0x1a4] ss:$16 sps:$4 sm:$0xff]   ;;  %v1226_v42 = vld [vmem:[#allocation2 + $0x1a0] ss:$16 sps:$4 sm:$0xff]   ;;  %v1280_v20 = vld [vmem:[#allocation2 + $0x88] ss:$16 sps:$4 sm:$0xff]  }
  0x22   :  { %v1224_v41 = vld [vmem:[#allocation2 + $0x3a4] ss:$16 sps:$4 sm:$0xff]   ;;  %v1227_v43 = vld [vmem:[#allocation2 + $0x3a0] ss:$16 sps:$4 sm:$0xff]   ;;  %v1283_v21 = vld [vmem:[#allocation2 + $0x288] ss:$16 sps:$4 sm:$0xff]  }
  0x23   :  { %845 = vmatpush1.bf16.msra.mxu0 %v1196_v22  ;;  %v1228_v44 = vld [vmem:[#allocation2 + $0x184] ss:$16 sps:$4 sm:$0xff]   ;;  %v1232_v49 = vld [vmem:[#allocation2 + $0x180] ss:$16 sps:$4 sm:$0xff]   ;;  %v1288_v22 = vld [vmem:[#allocation2 + $0x6c] ss:$16 sps:$4 sm:$0xff]  }
  0x24   :  { %886 = vmatpush1.bf16.msra.mxu1 %v1197_v23  ;;  %846 = vmatprep.subr.bf16.mxu0 %v1198_v24  ;;  %v1230_v45 = vld [vmem:[#allocation2 + $0x384] ss:$16 sps:$4 sm:$0xff]   ;;  %v1233_v50 = vld [vmem:[#allocation2 + $0x380] ss:$16 sps:$4 sm:$0xff]   ;;  %v1291_v23 = vld [vmem:[#allocation2 + $0x26c] ss:$16 sps:$4 sm:$0xff]  }
  0x25   :  { %887 = vmatprep.subr.bf16.mxu1 %v1200_v25  ;;  %v28_v46 = vld [vmem:[%s1455_s0] sm:$0xff]  ;;  %v1286_v24 = vld [vmem:[#allocation2 + $0x68] ss:$16 sps:$4 sm:$0xff]  }
  0x26   :  { %v1425_v47 = vcombine.high %v28_v46, %v28_v46  ;;  %v1234_v52 = vld [vmem:[#allocation2 + $0x164] ss:$16 sps:$4 sm:$0xff]   ;;  %v1238_v54 = vld [vmem:[#allocation2 + $0x160] ss:$16 sps:$4 sm:$0xff]   ;;  %v1431_v6 = vcombine.low %v28_v46, %v28_v46  ;;  %v1289_v25 = vld [vmem:[#allocation2 + $0x268] ss:$16 sps:$4 sm:$0xff]  }
  0x27   :  { %847 = vmatpush1.bf16.msra.mxu0 %v1202_v26  ;;  %v1236_v53 = vld [vmem:[#allocation2 + $0x364] ss:$16 sps:$4 sm:$0xff]   ;;  %v1239_v55 = vld [vmem:[#allocation2 + $0x360] ss:$16 sps:$4 sm:$0xff]   ;;  %v1294_v26 = vld [vmem:[#allocation2 + $0x4c] ss:$16 sps:$4 sm:$0xff]  }
  0x28   :  { %888 = vmatpush1.bf16.msra.mxu1 %v1203_v27  ;;  %848 = vmatprep.subr.bf16.mxu0 %v1204_v28  ;;  %v1240_v56 = vld [vmem:[#allocation2 + $0x144] ss:$16 sps:$4 sm:$0xff]   ;;  %v1244_v58 = vld [vmem:[#allocation2 + $0x140] ss:$16 sps:$4 sm:$0xff]   ;;  %v1297_v27 = vld [vmem:[#allocation2 + $0x24c] ss:$16 sps:$4 sm:$0xff]  }
  0x29   :  { %889 = vmatprep.subr.bf16.mxu1 %v1206_v29  ;;  %866 = vmatprep.mubr.bf16.mxu0 %v1425_v47  ;;  %v1242_v57 = vld [vmem:[#allocation2 + $0x344] ss:$16 sps:$4 sm:$0xff]   ;;  %v1245_v59 = vld [vmem:[#allocation2 + $0x340] ss:$16 sps:$4 sm:$0xff]   ;;  %v1292_v28 = vld [vmem:[#allocation2 + $0x48] ss:$16 sps:$4 sm:$0xff]  }
  0x2a   :  { %v1246_v60 = vld [vmem:[#allocation2 + $0x124] ss:$16 sps:$4 sm:$0xff]   ;;  %v1250_v62 = vld [vmem:[#allocation2 + $0x120] ss:$16 sps:$4 sm:$0xff]   ;;  %v1295_v29 = vld [vmem:[#allocation2 + $0x248] ss:$16 sps:$4 sm:$0xff]  }
  0x2b   :  { %849 = vmatpush1.bf16.msra.mxu0 %v1208_v30  ;;  %v1248_v61 = vld [vmem:[#allocation2 + $0x324] ss:$16 sps:$4 sm:$0xff]   ;;  %v1251_v63 = vld [vmem:[#allocation2 + $0x320] ss:$16 sps:$4 sm:$0xff]   ;;  %v1300_v30 = vld [vmem:[#allocation2 + $0x2c] ss:$16 sps:$4 sm:$0xff]  }
  0x2c   :  { %890 = vmatpush1.bf16.msra.mxu1 %v1209_v31  ;;  %850 = vmatprep.subr.bf16.mxu0 %v1210_v32  ;;  %v1252_v0 = vld [vmem:[#allocation2 + $0x104] ss:$16 sps:$4 sm:$0xff]   ;;  %v1256_v2 = vld [vmem:[#allocation2 + $0x100] ss:$16 sps:$4 sm:$0xff]   ;;  %v1303_v31 = vld [vmem:[#allocation2 + $0x22c] ss:$16 sps:$4 sm:$0xff]  }
  0x2d   :  { %891 = vmatprep.subr.bf16.mxu1 %v1212_v33  ;;  %v1254_v1 = vld [vmem:[#allocation2 + $0x304] ss:$16 sps:$4 sm:$0xff]   ;;  %v1257_v3 = vld [vmem:[#allocation2 + $0x300] ss:$16 sps:$4 sm:$0xff]   ;;  %v1298_v32 = vld [vmem:[#allocation2 + $0x28] ss:$16 sps:$4 sm:$0xff]  }
  0x2e   :  { %v1301_v33 = vld [vmem:[#allocation2 + $0x228] ss:$16 sps:$4 sm:$0xff]   ;;  %v1324_v46 = vld [vmem:[#allocation2 + $0x1ac] ss:$16 sps:$4 sm:$0xff]  }
  0x2f   :  { %851 = vmatpush2.bf16.msra.mxu0 %v1214_v34  ;;  %v1306_v34 = vld [vmem:[#allocation2 + $0xc] ss:$16 sps:$4 sm:$0xff]  }
  0x30   :  { %892 = vmatpush2.bf16.msra.mxu1 %v1215_v35  ;;  %852 = vmatprep.subr.bf16.mxu0 %v1216_v36  ;;  %v1309_v35 = vld [vmem:[#allocation2 + $0x20c] ss:$16 sps:$4 sm:$0xff]   ;;  %v1304_v36 = vld [vmem:[#allocation2 + $0x8] ss:$16 sps:$4 sm:$0xff]  }
  0x31   :  { %893 = vmatprep.subr.bf16.mxu1 %v1218_v37  ;;  %v1307_v37 = vld [vmem:[#allocation2 + $0x208] ss:$16 sps:$4 sm:$0xff]  }
  0x33   :  { %853 = vmatpush2.bf16.msra.mxu0 %v1220_v38  ;;  %v1312_v38 = vld [vmem:[#allocation2 + $0x1ec] ss:$16 sps:$4 sm:$0xff]  }
  0x34   :  { %894 = vmatpush2.bf16.msra.mxu1 %v1221_v39  ;;  %854 = vmatprep.subr.bf16.mxu0 %v1222_v40  ;;  %v1315_v39 = vld [vmem:[#allocation2 + $0x3ec] ss:$16 sps:$4 sm:$0xff]   ;;  %v1310_v40 = vld [vmem:[#allocation2 + $0x1e8] ss:$16 sps:$4 sm:$0xff]  }
  0x35   :  { %895 = vmatprep.subr.bf16.mxu1 %v1224_v41  ;;  %v1313_v41 = vld [vmem:[#allocation2 + $0x3e8] ss:$16 sps:$4 sm:$0xff]  }
  0x37   :  { %855 = vmatpush2.bf16.msra.mxu0 %v1226_v42  ;;  %v1318_v42 = vld [vmem:[#allocation2 + $0x1cc] ss:$16 sps:$4 sm:$0xff]  }
  0x38   :  { %896 = vmatpush2.bf16.msra.mxu1 %v1227_v43  ;;  %856 = vmatprep.subr.bf16.mxu0 %v1228_v44  ;;  %v1321_v43 = vld [vmem:[#allocation2 + $0x3cc] ss:$16 sps:$4 sm:$0xff]   ;;  %v1316_v44 = vld [vmem:[#allocation2 + $0x1c8] ss:$16 sps:$4 sm:$0xff]  }
  0x39   :  { %897 = vmatprep.subr.bf16.mxu1 %v1230_v45  ;;  %v1319_v45 = vld [vmem:[#allocation2 + $0x3c8] ss:$16 sps:$4 sm:$0xff]  }
  0x3b   :  { %857 = vmatpush2.bf16.msra.mxu0 %v1232_v49  ;;  %v1325_v49 = vld [vmem:[#allocation2 + $0x3a8] ss:$16 sps:$4 sm:$0xff]  }
  0x3c   :  { %898 = vmatpush2.bf16.msra.mxu1 %v1233_v50  ;;  %858 = vmatprep.subr.bf16.mxu0 %v1234_v52  ;;  %v1330_v50 = vld [vmem:[#allocation2 + $0x18c] ss:$16 sps:$4 sm:$0xff]   ;;  %v1328_v52 = vld [vmem:[#allocation2 + $0x188] ss:$16 sps:$4 sm:$0xff]  }
  0x3d   :  { %899 = vmatprep.subr.bf16.mxu1 %v1236_v53  ;;  %v1331_v53 = vld [vmem:[#allocation2 + $0x388] ss:$16 sps:$4 sm:$0xff]  }
  0x3f   :  { %859 = vmatpush2.bf16.msra.mxu0 %v1238_v54  ;;  %v1336_v54 = vld [vmem:[#allocation2 + $0x16c] ss:$16 sps:$4 sm:$0xff]  }
  0x40   :  { %900 = vmatpush2.bf16.msra.mxu1 %v1239_v55  ;;  %860 = vmatprep.subr.bf16.mxu0 %v1240_v56  ;;  %v1339_v55 = vld [vmem:[#allocation2 + $0x36c] ss:$16 sps:$4 sm:$0xff]   ;;  %v1334_v56 = vld [vmem:[#allocation2 + $0x168] ss:$16 sps:$4 sm:$0xff]  }
  0x41   :  { %901 = vmatprep.subr.bf16.mxu1 %v1242_v57  ;;  %v1337_v57 = vld [vmem:[#allocation2 + $0x368] ss:$16 sps:$4 sm:$0xff]  }
  0x43   :  { %861 = vmatpush2.bf16.msra.mxu0 %v1244_v58  ;;  %v1342_v58 = vld [vmem:[#allocation2 + $0x14c] ss:$16 sps:$4 sm:$0xff]  }
  0x44   :  { %902 = vmatpush2.bf16.msra.mxu1 %v1245_v59  ;;  %862 = vmatprep.subr.bf16.mxu0 %v1246_v60  ;;  %v1345_v59 = vld [vmem:[#allocation2 + $0x34c] ss:$16 sps:$4 sm:$0xff]   ;;  %v1340_v60 = vld [vmem:[#allocation2 + $0x148] ss:$16 sps:$4 sm:$0xff]  }
  0x45   :  { %903 = vmatprep.subr.bf16.mxu1 %v1248_v61  ;;  %v1343_v61 = vld [vmem:[#allocation2 + $0x348] ss:$16 sps:$4 sm:$0xff]  }
  0x47   :  { %863 = vmatpush2.bf16.msra.mxu0 %v1250_v62  ;;  %v1348_v62 = vld [vmem:[#allocation2 + $0x12c] ss:$16 sps:$4 sm:$0xff]  }
  0x48   :  { %904 = vmatpush2.bf16.msra.mxu1 %v1251_v63  ;;  %864 = vmatprep.subr.bf16.mxu0 %v1252_v0  ;;  %v1351_v63 = vld [vmem:[#allocation2 + $0x32c] ss:$16 sps:$4 sm:$0xff]   ;;  %v1346_v0 = vld [vmem:[#allocation2 + $0x128] ss:$16 sps:$4 sm:$0xff]  }
  0x49   :  { %905 = vmatprep.subr.bf16.mxu1 %v1254_v1  ;;  %v1349_v1 = vld [vmem:[#allocation2 + $0x328] ss:$16 sps:$4 sm:$0xff]  }
  0x4b   :  { %865 = vmatpush2.bf16.msra.mxu0 %v1256_v2  ;;  %v1354_v2 = vld [vmem:[#allocation2 + $0x10c] ss:$16 sps:$4 sm:$0xff]  }
  0x4c   :  { %906 = vmatpush2.bf16.msra.mxu1 %v1257_v3  ;;  %916 = vmatprep.subr.bf16.mxu0 %v1264_v4  ;;  %v1357_v3 = vld [vmem:[#allocation2 + $0x30c] ss:$16 sps:$4 sm:$0xff]   ;;  %v1352_v4 = vld [vmem:[#allocation2 + $0x108] ss:$16 sps:$4 sm:$0xff]  }
  0x4d   :  { %957 = vmatprep.subr.bf16.mxu1 %v1267_v5  ;;  %v1355_v5 = vld [vmem:[#allocation2 + $0x308] ss:$16 sps:$4 sm:$0xff]  }
  0x4e   :  { %867 = vmatmul.mubr.bf16.vlgmr.msra.gmra.mxu0 %v1431_v6 }
  0x4f   :  { %908 = vmatmul.mubr.bf16.vlgmr.msra.gmra.mxu1 %v1433_v7  ;;  %917 = vmatpush1.bf16.msra.mxu0 %v1262_v8  ;;  %v160_v8 = vlaneseq }
  0x50   :  { %958 = vmatpush1.bf16.msra.mxu1 %v1265_v9  ;;  %918 = vmatprep.subr.bf16.mxu0 %v1270_v10 }
  0x51   :  { %959 = vmatprep.subr.bf16.mxu1 %v1273_v11  ;;  %948 = vmatprep.mubr.bf16.mxu0 %v1425_v47  ;;  %v1327_v47 = vld [vmem:[#allocation2 + $0x3ac] ss:$16 sps:$4 sm:$0xff]   ;;  %v161_v9 = vshrl.u32 %v160_v8, 7  ;;  %v158_v11 = vld [vmem:[%s1457_s2] sm:$0xf] }
  0x52   :  { %989 = vmatprep.mubr.bf16.mxu1 %v1030_v51  ;;  %v1333_v51 = vld [vmem:[#allocation2 + $0x38c] ss:$16 sps:$4 sm:$0xff]  }
  0x53   :  { %919 = vmatpush1.bf16.msra.mxu0 %v1268_v12  ;;  %v162_v10 = vsub.s32 0, %v161_v9  ;;  %v166_v12 = vsub.s32 1, %v161_v9 }
  0x54   :  { %960 = vmatpush1.bf16.msra.mxu1 %v1271_v13  ;;  %920 = vmatprep.subr.bf16.mxu0 %v1276_v14 }
  0x55   :  { %961 = vmatprep.subr.bf16.mxu1 %v1279_v15  ;;  %v163_v13 = vrot.slane %v158_v11, %v162_v10  ;;  %v167_v14 = vrot.slane %v158_v11, %v166_v12 }
  0x57   :  { %921 = vmatpush1.bf16.msra.mxu0 %v1274_v16 }
  0x58   :  { %962 = vmatpush1.bf16.msra.mxu1 %v1277_v17  ;;  %922 = vmatprep.subr.bf16.mxu0 %v1282_v18 }
  0x59   :  { %963 = vmatprep.subr.bf16.mxu1 %v1285_v19 }
  0x5b   :  { %923 = vmatpush1.bf16.msra.mxu0 %v1280_v20 }
  0x5c   :  { %964 = vmatpush1.bf16.msra.mxu1 %v1283_v21  ;;  %924 = vmatprep.subr.bf16.mxu0 %v1288_v22 }
  0x5d   :  { %965 = vmatprep.subr.bf16.mxu1 %v1291_v23 }
  0x5f   :  { %925 = vmatpush1.bf16.msra.mxu0 %v1286_v24 }
  0x60   :  { %966 = vmatpush1.bf16.msra.mxu1 %v1289_v25  ;;  %926 = vmatprep.subr.bf16.mxu0 %v1294_v26 }
  0x61   :  { %967 = vmatprep.subr.bf16.mxu1 %v1297_v27 }
  0x63   :  { %927 = vmatpush1.bf16.msra.mxu0 %v1292_v28 }
  0x64   :  { %968 = vmatpush1.bf16.msra.mxu1 %v1295_v29  ;;  %928 = vmatprep.subr.bf16.mxu0 %v1300_v30 }
  0x65   :  { %969 = vmatprep.subr.bf16.mxu1 %v1303_v31 }
  0x67   :  { %929 = vmatpush1.bf16.msra.mxu0 %v1298_v32 }
  0x68   :  { %970 = vmatpush1.bf16.msra.mxu1 %v1301_v33  ;;  %930 = vmatprep.subr.bf16.mxu0 %v1306_v34 }
  0x69   :  { %971 = vmatprep.subr.bf16.mxu1 %v1309_v35  ;;  %v170_v35 = vsub.s32 2, %v161_v9 }
  0x6b   :  { %931 = vmatpush1.bf16.msra.mxu0 %v1304_v36  ;;  %v174_v36 = vsub.s32 3, %v161_v9 }
  0x6c   :  { %972 = vmatpush1.bf16.msra.mxu1 %v1307_v37  ;;  %932 = vmatprep.subr.bf16.mxu0 %v1312_v38  ;;  %v171_v37 = vrot.slane %v158_v11, %v170_v35 }
  0x6d   :  { %973 = vmatprep.subr.bf16.mxu1 %v1315_v39  ;;  %v175_v38 = vrot.slane %v158_v11, %v174_v36 }
  0x6f   :  { %933 = vmatpush2.bf16.msra.mxu0 %v1310_v40 }
  0x70   :  { %974 = vmatpush2.bf16.msra.mxu1 %v1313_v41  ;;  %934 = vmatprep.subr.bf16.mxu0 %v1318_v42 }
  0x71   :  { %975 = vmatprep.subr.bf16.mxu1 %v1321_v43 }
  0x73   :  { %935 = vmatpush2.bf16.msra.mxu0 %v1316_v44 }
  0x74   :  { %976 = vmatpush2.bf16.msra.mxu1 %v1319_v45  ;;  %936 = vmatprep.subr.bf16.mxu0 %v1324_v46 }
  0x75   :  { %977 = vmatprep.subr.bf16.mxu1 %v1327_v47 }
  0x77   :  { %937 = vmatpush2.bf16.msra.mxu0 %v1322_v48 }
  0x78   :  { %978 = vmatpush2.bf16.msra.mxu1 %v1325_v49  ;;  %938 = vmatprep.subr.bf16.mxu0 %v1330_v50 }
  0x79   :  { %979 = vmatprep.subr.bf16.mxu1 %v1333_v51 }
  0x7b   :  { %939 = vmatpush2.bf16.msra.mxu0 %v1328_v52 }
  0x7c   :  { %980 = vmatpush2.bf16.msra.mxu1 %v1331_v53  ;;  %940 = vmatprep.subr.bf16.mxu0 %v1336_v54 }
  0x7d   :  { %981 = vmatprep.subr.bf16.mxu1 %v1339_v55 }
  0x7f   :  { %941 = vmatpush2.bf16.msra.mxu0 %v1334_v56 }
  0x80   :  { %982 = vmatpush2.bf16.msra.mxu1 %v1337_v57  ;;  %942 = vmatprep.subr.bf16.mxu0 %v1342_v58 }
  0x81   :  { %983 = vmatprep.subr.bf16.mxu1 %v1345_v59 }
  0x83   :  { %943 = vmatpush2.bf16.msra.mxu0 %v1340_v60 }
  0x84   :  { %984 = vmatpush2.bf16.msra.mxu1 %v1343_v61  ;;  %944 = vmatprep.subr.bf16.mxu0 %v1348_v62 }
  0x85   :  { %985 = vmatprep.subr.bf16.mxu1 %v1351_v63 }
  0x87   :  { %945 = vmatpush2.bf16.msra.mxu0 %v1346_v0 }
  0x88   :  { %986 = vmatpush2.bf16.msra.mxu1 %v1349_v1  ;;  %946 = vmatprep.subr.bf16.mxu0 %v1354_v2 }
  0x89   :  { %987 = vmatprep.subr.bf16.mxu1 %v1357_v3 }
  0x8b   :  { %947 = vmatpush2.bf16.msra.mxu0 %v1352_v4 }
  0x8c   :  { %988 = vmatpush2.bf16.msra.mxu1 %v1355_v5 }
  0x8e   :  { %949 = vmatmul.mubr.bf16.vlgmr.msra.gmra.mxu0 %v1431_v6 }
  0x8f   :  { %990 = vmatmul.mubr.bf16.vlgmr.msra.gmra.mxu1 %v1433_v7 }
 0x10e   :  { %v868_v15 = vpop.f32.mrf.mxu0 }
 0x10f   :  { %v909_v16 = vpop.f32.mrf.mxu1  ;;  %v869_v17 = vadd.f32 %v868_v15, %v163_v13 }
 0x110   :  { %v870_v18 = vpop.f32.mrf.mxu0 }
 0x111   :  { %v911_v19 = vpop.f32.mrf.mxu1  ;;  %v910_v20 = vadd.f32 %v909_v16, %v869_v17  ;;  %v871_v21 = vadd.f32 %v870_v18, %v167_v14 }
 0x112   :  { %v872_v6 = vpop.f32.mrf.mxu0 }
 0x113   :  { %v913_v22 = vpop.f32.mrf.mxu1  ;;  %v998_v7 = vsub.f32 0.0, %v910_v20  ;;  %v912_v23 = vadd.f32 %v911_v19, %v871_v21 }
 0x114   :  { %v873_v24 = vpop.f32.mrf.mxu0 }
 0x115   :  { %v914_v25 = vpop.f32.mrf.mxu1  ;;  %v1002_v26 = vmul.f32 1.442695, %v998_v7  ;;  %v999_v27 = vsub.f32 0.0, %v912_v23 }
 0x117   :  { %1358 = vpow2.f32 %v1002_v26  ;;  %v1004_v28 = vmul.f32 1.442695, %v999_v27 }
 0x119   :  { %1360 = vpow2.f32 %v1004_v28 }
 0x124   :  { %v1359_v29 = vpop.eup %1358 }
 0x125   :  { %v1010_v30 = vadd.f32 1.0, %v1359_v29 }
 0x126   :  { %v1361_v31 = vpop.eup %1360 }
 0x127   :  { %1362 = vrcp.f32 %v1010_v30  ;;  %v1011_v32 = vadd.f32 1.0, %v1361_v31 }
 0x129   :  { %1364 = vrcp.f32 %v1011_v32 }
 0x134   :  { %v1363_v33 = vpop.eup %1362 }
 0x135   :  { %1018 = vst [vmem:[%s1458_s3] sm:$0xff] %v1363_v33 }
 0x136   :  { %v1365_v34 = vpop.eup %1364 }
 0x137   :  { %1019 = vst [vmem:[%s1458_s3 + $0x8] sm:$0xff] %v1365_v34 }
 0x14e   :  { %v950_v39 = vpop.f32.mrf.mxu0 }
 0x14f   :  { %v991_v40 = vpop.f32.mrf.mxu1  ;;  %v951_v41 = vadd.f32 %v950_v39, %v171_v37 }
 0x150   :  { %v952_v42 = vpop.f32.mrf.mxu0 }
 0x151   :  { %v993_v43 = vpop.f32.mrf.mxu1  ;;  %v992_v44 = vadd.f32 %v991_v40, %v951_v41  ;;  %v953_v45 = vadd.f32 %v952_v42, %v175_v38 }
 0x152   :  { %v954_v46 = vpop.f32.mrf.mxu0 }
 0x153   :  { %v995_v47 = vpop.f32.mrf.mxu1  ;;  %v1000_v48 = vsub.f32 0.0, %v992_v44  ;;  %v994_v49 = vadd.f32 %v993_v43, %v953_v45 }
 0x154   :  { %v955_v50 = vpop.f32.mrf.mxu0 }
 0x155   :  { %v996_v51 = vpop.f32.mrf.mxu1  ;;  %v1006_v52 = vmul.f32 1.442695, %v1000_v48  ;;  %v1001_v53 = vsub.f32 0.0, %v994_v49 }
 0x157   :  { %1366 = vpow2.f32 %v1006_v52  ;;  %v1008_v54 = vmul.f32 1.442695, %v1001_v53 }
 0x159   :  { %1368 = vpow2.f32 %v1008_v54 }
 0x164   :  { %v1367_v55 = vpop.eup %1366 }
 0x165   :  { %v1012_v56 = vadd.f32 1.0, %v1367_v55 }
 0x166   :  { %v1369_v57 = vpop.eup %1368 }
 0x167   :  { %1370 = vrcp.f32 %v1012_v56  ;;  %v1013_v58 = vadd.f32 1.0, %v1369_v57 }
 0x169   :  { %1372 = vrcp.f32 %v1013_v58 }
 0x174   :  { %v1371_v59 = vpop.eup %1370 }
 0x175   :  { %1020 = vst [vmem:[%s1458_s3 + $0x10] sm:$0xff] %v1371_v59 }
 0x176   :  { %v1373_v60 = vpop.eup %1372 }
 0x177   :  { %1021 = vst [vmem:[%s1458_s3 + $0x18] sm:$0xff] %v1373_v60 }
 0x178   :  { %1026 = vsyncpa [#allocation3], 1 }

</bundles_post_ra>
